<compile_context>
chip_gen: v7x
topology: tpu7x:2x2x1
jax: 0.10.0
libtpu: 0.0.40
codegen_flags: <defaults>
</compile_context>

<pallas_src>
import functools

import jax
import jax.numpy as jnp
from jax import lax
from jax.experimental import pallas as pl
from jax.experimental.pallas import tpu as pltpu

_LANES = 128
_SUBLANES = 8
# 1024 * 128 * 4 B = 512 KiB per buffer; 2 inputs x 2 pipeline buffers = 2 MiB,
# comfortably within the scoped-VMEM defaults on v5e/v6e/v7x.
_MAX_TILE_ROWS = 1024


def _as_rows128(a: jax.Array) -> jax.Array:
    """Flatten to (rows, 128); pads only a ragged <128-element tail (keeps dtype)."""
    flat = a.reshape(-1)
    n = flat.shape[0]
    rem = n % _LANES
    if rem:
        flat = jnp.pad(flat, (0, _LANES - rem))
    return flat.reshape(-1, _LANES)


def _round_up(x: int, m: int) -> int:
    return -(-x // m) * m


def _vae_loss_kernel(recon_ref, x_ref, mu_ref, lv_ref, loss_ref, mse_ref,
                     acc_ref, *, rows: int, tile_rows: int, mask_rows: bool):
    pid = pl.program_id(0)

    @pl.when(pid == 0)
    def _init():
        acc_ref[...] = jnp.zeros_like(acc_ref)

    diff = recon_ref[...].astype(jnp.float32) - x_ref[...].astype(jnp.float32)
    if mask_rows:
        # Mask garbage rows of the (possibly partial) last block.
        row_id = pid * tile_rows + lax.broadcasted_iota(
            jnp.int32, (tile_rows, _LANES), 0)
        diff = jnp.where(row_id < rows, diff, 0.0)
    sq = diff * diff
    # Fold (tile_rows, 128) -> (8, 128): pure vreg-wise adds, no XLU per step.
    acc_ref[...] += jnp.sum(
        sq.reshape(tile_rows // _SUBLANES, _SUBLANES, _LANES), axis=0)

    @pl.when(pid == pl.num_programs(0) - 1)
    def _finalize():
        mse = jnp.sum(acc_ref[...])  # single cross-lane reduce at the end
        mu = mu_ref[...].astype(jnp.float32)
        lv = lv_ref[...].astype(jnp.float32)
        kld = -0.5 * jnp.sum(1.0 + lv - mu * mu - jnp.exp(lv))
        mse_ref[0, 0] = mse
        loss_ref[0, 0] = mse + kld


def vae_loss(recon_x, x, mu, log_var):
    """Returns (mse + kld, mse), matching the PyTorch module's forward."""
    recon_t = _as_rows128(recon_x)
    x_t = _as_rows128(x)
    mu_t = mu.reshape(1, -1)
    lv_t = log_var.reshape(1, -1)

    rows = recon_t.shape[0]
    latent = mu_t.shape[1]

    if rows <= _MAX_TILE_ROWS:
        tile_rows = rows if rows % _SUBLANES == 0 else _round_up(rows, _SUBLANES)
    else:
        tile_rows = _MAX_TILE_ROWS
    num_tiles = -(-rows // tile_rows)
    mask_rows = (rows % tile_rows) != 0

    kernel = functools.partial(
        _vae_loss_kernel, rows=rows, tile_rows=tile_rows, mask_rows=mask_rows)

    def _nbytes(a):
        return int(a.size) * a.dtype.itemsize

    cost = pl.CostEstimate(
        flops=int(3 * recon_t.size + 6 * latent),
        transcendentals=int(latent),
        bytes_accessed=_nbytes(recon_t) + _nbytes(x_t)
        + _nbytes(mu_t) + _nbytes(lv_t) + 8,
    )

    grid_spec = pltpu.PrefetchScalarGridSpec(
        num_scalar_prefetch=0,
        grid=(num_tiles,),
        in_specs=[
            pl.BlockSpec((tile_rows, _LANES), lambda i: (i, 0)),
            pl.BlockSpec((tile_rows, _LANES), lambda i: (i, 0)),
            pl.BlockSpec((1, latent), lambda i: (0, 0)),  # resident latents
            pl.BlockSpec((1, latent), lambda i: (0, 0)),
        ],
        out_specs=(
            pl.BlockSpec((1, 1), lambda i: (0, 0), memory_space=pltpu.SMEM),
            pl.BlockSpec((1, 1), lambda i: (0, 0), memory_space=pltpu.SMEM),
        ),
        scratch_shapes=[pltpu.VMEM((_SUBLANES, _LANES), jnp.float32)],
    )

    # TODO(synk): on v7x a leading size-2 "parallel" grid axis with per-core
    # partial-sum outputs (combined in the wrapper) would use both TensorCores.
    loss_out, mse_out = pl.pallas_call(
        kernel,
        out_shape=(
            jax.ShapeDtypeStruct((1, 1), jnp.float32),
            jax.ShapeDtypeStruct((1, 1), jnp.float32),
        ),
        grid_spec=grid_spec,
        compiler_params=pltpu.CompilerParams(
            dimension_semantics=("arbitrary",),
            vmem_limit_bytes=32 * 1024 * 1024,
        ),
        cost_estimate=cost,
    )(recon_t, x_t, mu_t, lv_t)

    return loss_out[0, 0], mse_out[0, 0]


def _vae_loss_ref(recon_x, x, mu, log_var):
    """Pure-JAX reference for verification."""
    mse = jnp.sum((recon_x.astype(jnp.float32) - x.astype(jnp.float32)) ** 2)
    lv = log_var.astype(jnp.float32)
    m = mu.astype(jnp.float32)
    kld = -0.5 * jnp.sum(1.0 + lv - m * m - jnp.exp(lv))
    return mse + kld, mse


if __name__ == "__main__":
    key = jax.random.PRNGKey(0)
    k1, k2, k3, k4 = jax.random.split(key, 4)

    # Small shapes consistent with a VAE forward:
    #   recon_x, x: image batch (N, C, H, W) = (2, 4, 16, 16)
    #   mu, log_var: latent stats (N, latent) = (2, 32)
    recon_x = jax.random.normal(k1, (2, 4, 16, 16), dtype=jnp.float32)
    x = jax.random.normal(k2, (2, 4, 16, 16), dtype=jnp.float32)
    mu = jax.random.normal(k3, (2, 32), dtype=jnp.float32)
    log_var = jax.random.normal(k4, (2, 32), dtype=jnp.float32) * 0.5

    loss, mse = vae_loss(recon_x, x, mu, log_var)
    jax.block_until_ready((loss, mse))

    loss_ref, mse_ref = _vae_loss_ref(recon_x, x, mu, log_var)
    assert jnp.allclose(loss, loss_ref, rtol=1e-5, atol=1e-4), (loss, loss_ref)
    assert jnp.allclose(mse, mse_ref, rtol=1e-5, atol=1e-4), (mse, mse_ref)

    print("KERNEL_OK")
</pallas_src>

<mosaic_0001>
module attributes {stable_mosaic.version = 11 : i64} {
  func.func @_vae_loss_kernel(%arg0: i32, %arg1: memref<16x128xf32, #tpu.memory_space<vmem>>, %arg2: memref<16x128xf32, #tpu.memory_space<vmem>>, %arg3: memref<1x64xf32, #tpu.memory_space<vmem>>, %arg4: memref<1x64xf32, #tpu.memory_space<vmem>>, %arg5: memref<1x1xf32, #tpu.memory_space<smem>>, %arg6: memref<1x1xf32, #tpu.memory_space<smem>>, %arg7: memref<8x128xf32, #tpu.memory_space<vmem>>) attributes {dimension_semantics = [#tpu.dimension_semantics<arbitrary>], iteration_bounds = array<i64: 1>, scalar_prefetch = 0 : i64, scratch_operands = 1 : i64, tpu.core_type = #tpu.core_type<tc>, window_params = [{transform_indices = @transform_0, window_bounds = array<i64: 16, 128>}, {transform_indices = @transform_1, window_bounds = array<i64: 16, 128>}, {pipeline_mode = #tpu.pipeline_mode<synchronous>, transform_indices = @transform_2, window_bounds = array<i64: 1, 64>}, {pipeline_mode = #tpu.pipeline_mode<synchronous>, transform_indices = @transform_3, window_bounds = array<i64: 1, 64>}, {transform_indices = @transform_4, window_bounds = array<i64: 1, 1>}, {transform_indices = @transform_5, window_bounds = array<i64: 1, 1>}]} {
    %c0_i32 = arith.constant 0 : i32
    %0 = arith.cmpi eq, %arg0, %c0_i32 : i32
    %1 = arith.extui %0 : i1 to i32
    %c0_i32_0 = arith.constant 0 : i32
    %2 = arith.cmpi ne, %1, %c0_i32_0 : i32
    scf.if %2 {
      %cst_10 = arith.constant 0.000000e+00 : f32
      %15 = vector.broadcast %cst_10 : f32 to vector<8x128xf32>
      %c0_11 = arith.constant 0 : index
      %c0_12 = arith.constant 0 : index
      %16 = vector.load %arg7[%c0_11, %c0_12] : memref<8x128xf32, #tpu.memory_space<vmem>>, vector<8x128xf32>
      tpu.vector_store %arg7[%c0_11, %c0_12], %15 {strides = array<i32>} : memref<8x128xf32, #tpu.memory_space<vmem>>, vector<8x128xf32>,
    } else {
    }
    %c0 = arith.constant 0 : index
    %c0_1 = arith.constant 0 : index
    %3 = vector.load %arg1[%c0, %c0_1] : memref<16x128xf32, #tpu.memory_space<vmem>>, vector<16x128xf32>
    %c0_2 = arith.constant 0 : index
    %c0_3 = arith.constant 0 : index
    %4 = vector.load %arg2[%c0_2, %c0_3] : memref<16x128xf32, #tpu.memory_space<vmem>>, vector<16x128xf32>
    %5 = arith.subf %3, %4 : vector<16x128xf32>
    %6 = arith.mulf %5, %5 : vector<16x128xf32>
    %c0_4 = arith.constant 0 : index
    %c0_5 = arith.constant 0 : index
    %7 = vector.load %arg7[%c0_4, %c0_5] : memref<8x128xf32, #tpu.memory_space<vmem>>, vector<8x128xf32>
    %8 = vector.shape_cast %6 : vector<16x128xf32> to vector<2x8x128xf32>
    %cst = arith.constant dense<0.000000e+00> : vector<8x128xf32>
    %9 = vector.multi_reduction <add>, %8, %cst [0] : vector<2x8x128xf32> to vector<8x128xf32>
    %10 = arith.addf %7, %9 : vector<8x128xf32>
    %c0_6 = arith.constant 0 : index
    %c0_7 = arith.constant 0 : index
    %11 = vector.load %arg7[%c0_6, %c0_7] : memref<8x128xf32, #tpu.memory_space<vmem>>, vector<8x128xf32>
    tpu.vector_store %arg7[%c0_6, %c0_7], %10 {strides = array<i32>} : memref<8x128xf32, #tpu.memory_space<vmem>>, vector<8x128xf32>,
    %c0_i32_8 = arith.constant 0 : i32
    %12 = arith.cmpi eq, %arg0, %c0_i32_8 : i32
    %13 = arith.extui %12 : i1 to i32
    %c0_i32_9 = arith.constant 0 : i32
    %14 = arith.cmpi ne, %13, %c0_i32_9 : i32
    scf.if %14 {
      %c0_10 = arith.constant 0 : index
      %c0_11 = arith.constant 0 : index
      %15 = vector.load %arg7[%c0_10, %c0_11] : memref<8x128xf32, #tpu.memory_space<vmem>>, vector<8x128xf32>
      %16 = vector.shape_cast %15 : vector<8x128xf32> to vector<1x8x128xf32>
      %cst_12 = arith.constant dense<0.000000e+00> : vector<1xf32>
      %17 = vector.multi_reduction <add>, %16, %cst_12 [1, 2] : vector<1x8x128xf32> to vector<1xf32>
      %18 = vector.shape_cast %17 : vector<1xf32> to vector<1x1x1xf32>
      %19 = vector.extract %18[0, 0, 0] : f32 from vector<1x1x1xf32>
      %c0_13 = arith.constant 0 : index
      %c0_14 = arith.constant 0 : index
      %20 = vector.load %arg3[%c0_13, %c0_14] : memref<1x64xf32, #tpu.memory_space<vmem>>, vector<1x64xf32>
      %c0_15 = arith.constant 0 : index
      %c0_16 = arith.constant 0 : index
      %21 = vector.load %arg4[%c0_15, %c0_16] : memref<1x64xf32, #tpu.memory_space<vmem>>, vector<1x64xf32>
      %cst_17 = arith.constant 1.000000e+00 : f32
      %22 = vector.broadcast %cst_17 : f32 to vector<1x64xf32>
      %23 = arith.addf %22, %21 : vector<1x64xf32>
      %24 = arith.mulf %20, %20 : vector<1x64xf32>
      %25 = arith.subf %23, %24 : vector<1x64xf32>
      %26 = math.exp %21 : vector<1x64xf32>
      %27 = arith.subf %25, %26 : vector<1x64xf32>
      %28 = vector.shape_cast %27 : vector<1x64xf32> to vector<1x1x64xf32>
      %cst_18 = arith.constant dense<0.000000e+00> : vector<1xf32>
      %29 = vector.multi_reduction <add>, %28, %cst_18 [1, 2] : vector<1x1x64xf32> to vector<1xf32>
      %30 = vector.shape_cast %29 : vector<1xf32> to vector<1x1x1xf32>
      %31 = vector.extract %30[0, 0, 0] : f32 from vector<1x1x1xf32>
      %cst_19 = arith.constant -5.000000e-01 : f32
      %32 = arith.mulf %cst_19, %31 : f32
      %c0_20 = arith.constant 0 : index
      %c0_21 = arith.constant 0 : index
      %33 = memref.load %arg6[%c0_20, %c0_21] : memref<1x1xf32, #tpu.memory_space<smem>>
      memref.store %19, %arg6[%c0_20, %c0_21] : memref<1x1xf32, #tpu.memory_space<smem>>
      %34 = arith.addf %19, %32 : f32
      %c0_22 = arith.constant 0 : index
      %c0_23 = arith.constant 0 : index
      %35 = memref.load %arg5[%c0_22, %c0_23] : memref<1x1xf32, #tpu.memory_space<smem>>
      memref.store %34, %arg5[%c0_22, %c0_23] : memref<1x1xf32, #tpu.memory_space<smem>>
    } else {
    }
    return
  }
  func.func @transform_0(%arg0: i32) -> (i32, i32) {
    %c0_i32 = arith.constant 0 : i32
    %c0_i32_0 = arith.constant 0 : i32
    return %arg0, %c0_i32 : i32, i32
  }
  func.func @transform_1(%arg0: i32) -> (i32, i32) {
    %c0_i32 = arith.constant 0 : i32
    %c0_i32_0 = arith.constant 0 : i32
    return %arg0, %c0_i32 : i32, i32
  }
  func.func @transform_2(%arg0: i32) -> (i32, i32) {
    %c0_i32 = arith.constant 0 : i32
    %c0_i32_0 = arith.constant 0 : i32
    %c0_i32_1 = arith.constant 0 : i32
    return %c0_i32, %c0_i32_0 : i32, i32
  }
  func.func @transform_3(%arg0: i32) -> (i32, i32) {
    %c0_i32 = arith.constant 0 : i32
    %c0_i32_0 = arith.constant 0 : i32
    %c0_i32_1 = arith.constant 0 : i32
    return %c0_i32, %c0_i32_0 : i32, i32
  }
  func.func @transform_4(%arg0: i32) -> (i32, i32) {
    %c0_i32 = arith.constant 0 : i32
    %c0_i32_0 = arith.constant 0 : i32
    %c0_i32_1 = arith.constant 0 : i32
    return %c0_i32, %c0_i32_0 : i32, i32
  }
  func.func @transform_5(%arg0: i32) -> (i32, i32) {
    %c0_i32 = arith.constant 0 : i32
    %c0_i32_0 = arith.constant 0 : i32
    %c0_i32_1 = arith.constant 0 : i32
    return %c0_i32, %c0_i32_0 : i32, i32
  }
}

</mosaic_0001>

<bundles_post_ra>
// kernel: tpu_custom_call.1
= control target key start
LH: loop header
LB: loop body
LE: loop exit
PB: predicated region body
PF: predicated region fallthrough
CT: control target
= control target key end

     0   :  { %11 = vsyncpa [#allocation4], 0  ;;  %s305_s0 = inlined_call_operand.hbm [shape: f32[16,128], index: 0, kind: input, shape index: {}]   ;;  %s306_s1 = inlined_call_operand.hbm [shape: f32[16,128], index: 1, kind: input, shape index: {}]   ;;  %s307_s2 = inlined_call_operand.vmem [shape: f32[1,64], index: 2, kind: input, shape index: {}]   ;;  %s308_s3 = inlined_call_operand.vmem [shape: f32[1,64], index: 3, kind: input, shape index: {}]   ;;  %s309_s4 = inlined_call_operand.hbm [shape: f32[1,1], index: 4, kind: output, shape index: {0}]   ;;  %s310_s5 = inlined_call_operand.hbm [shape: f32[1,1], index: 5, kind: output, shape index: {1}]  }
   0x1   :  { %12 = vsyncpa [#allocation7], 0 }
   0x2   :  { %13 = vsyncpa [#allocation5], 0 }
   0x3   :  { %14 = vsyncpa [#allocation10], 0  ;;  %s215_s18 = smov [#allocation3]   ;;  %s143_s22 = scalar_lea.hbm %s305_s0, 256 }
   0x4   :  { %s20_s19 = sshll.u32 %s215_s18, 4  ;;  %p144_p0 = scmp.ne.s32.totalorder %s305_s0, %s143_s22  ;;  %s21_s19 = int_to_ptr.vmem [resolvable:$true] %s20_s19 }
   0x5   :  { %p147_p1 = scmp.lt.u32.totalorder %s143_s22, %s305_s0 }
   0x7   :  { %p149_p2 = pnand %p147_p1, %p144_p0 }
   0x9   :  { %152 = shalt.err (!%p149_p2)
}
   0xa   :  { %s153_s27 = scalar_lea.vmem %s21_s19, 256  ;;  %p158_p4 = scmp.lt.s32.totalorder %s21_s19, %s21_s19 }
   0xb   :  { %p154_p3 = scmp.ne.s32.totalorder %s21_s19, %s153_s27  ;;  %p159_p5 = scmp.lt.s32.totalorder %s153_s27, %s153_s27 }
   0xd   :  { %p160_p6 = por %p159_p5, %p158_p4 }
   0xf   :  { %p161_p7 = pnand %p160_p6, %p154_p3 }
  0x11   :  { %164 = shalt.err (!%p161_p7)
}
  0x12   :  { %s216_s28 = smov 128   ;;  %s217_s29 = smov 8  }
  0x13   :  { %26 = dma.hbm_to_vmem [thread:$0]  %s305_s0, 256, %s21_s19, [#allocation4], %s216_s28, %s216_s28, %s217_s29  }
  0x14   :  { %s218_s7 = smov [#allocation6]   ;;  %s165_s11 = scalar_lea.hbm %s306_s1, 256 }
  0x15   :  { %s32_s8 = sshll.u32 %s218_s7, 4  ;;  %p166_p8 = scmp.ne.s32.totalorder %s306_s1, %s165_s11  ;;  %s33_s8 = int_to_ptr.vmem [resolvable:$true] %s32_s8 }
  0x16   :  { %p169_p9 = scmp.lt.u32.totalorder %s165_s11, %s306_s1 }
  0x18   :  { %p171_p10 = pnand %p169_p9, %p166_p8 }
  0x1a   :  { %174 = shalt.err (!%p171_p10)
}
  0x1b   :  { %s175_s16 = scalar_lea.vmem %s33_s8, 256  ;;  %p180_p12 = scmp.lt.s32.totalorder %s33_s8, %s33_s8 }
  0x1c   :  { %p176_p11 = scmp.ne.s32.totalorder %s33_s8, %s175_s16  ;;  %p181_p13 = scmp.lt.s32.totalorder %s175_s16, %s175_s16 }
  0x1e   :  { %p182_p0 = por %p181_p13, %p180_p12 }
  0x20   :  { %p183_p1 = pnand %p182_p0, %p176_p11 }
  0x22   :  { %186 = shalt.err (!%p183_p1)
}
  0x23   :  { %38 = dma.hbm_to_vmem [thread:$0]  %s306_s1, 256, %s33_s8, [#allocation7], %s216_s28, %s216_s28, %s217_s29  }
  0x24   :  { %207 = dma.done.wait [#allocation4], 256  }
  0x25   :  { %208 = vsyncadd [#allocation4], 4294967040 }
  0x26   :  { %209 = dma.done.wait [#allocation7], 256  }
  0x27   :  { %210 = vsyncadd [#allocation7], 4294967040  ;;  %v54_v0 = vld [vmem:[#allocation3] sm:$0xff]  ;;  %v55_v1 = vld [vmem:[#allocation3 + $0x8] sm:$0xff]  ;;  %vm87_vm0 = vcmask 516096   ;;  %s187_s22 = scalar_lea.hbm %s310_s5, 16 }
  0x28   :  { %v56_v2 = vld [vmem:[#allocation6] sm:$0xff]  ;;  %v57_v3 = vld [vmem:[#allocation6 + $0x8] sm:$0xff]  ;;  %v80_v5 = vld [vmem:[%s308_s3] sm:$0x1]  ;;  %p188_p2 = scmp.ne.s32.totalorder %s310_s5, %s187_s22  ;;  %p191_p3 = scmp.lt.u32.totalorder %s187_s22, %s310_s5 }
  0x29   :  { %v58_v4 = vsub.f32 %v54_v0, %v56_v2  ;;  %v59_v6 = vsub.f32 %v55_v1, %v57_v3  ;;  %v84_v7 = vmul.f32 1.442695, %v80_v5  ;;  %v79_v10 = vld [vmem:[%s307_s2] sm:$0x1]  ;;  %v81_v12 = vadd.f32 1.0, %v80_v5 }
  0x2a   :  { %v82_v13 = vmul.f32 %v79_v10, %v79_v10  ;;  %p193_p4 = pnand %p191_p3, %p188_p2 }
  0x2b   :  { %v60_v8 = vmul.f32 %v58_v4, %v58_v4  ;;  %v61_v9 = vmul.f32 %v59_v6, %v59_v6  ;;  %141 = vpow2.f32 %v84_v7 }
  0x2c   :  { %v83_v14 = vsub.f32 %v81_v12, %v82_v13 }
  0x2d   :  { %v63_v11 = vadd.f32 %v61_v9, %v60_v8 }
  0x2f   :  { %70 = vadd.xlane.f32.xlu0 %v63_v11 }
  0x35   :  { %v142_v15 = vpop.eup %141 }
  0x36   :  { %v86_v16 = vsub.f32 %v83_v14, %v142_v15 }
  0x38   :  { %v88_v17 = vsel %vm87_vm0, %v86_v16, 0.0 }
  0x39   :  { %89 = vadd.xlane.f32.xlu0 %v88_v17 }
  0xbc   :  { %v71_v18 = vpop.xlane.xlu0 %70 }
  0xbd   :  { %v72_v19 = vrot.slane %v71_v18, 4 }
  0xbf   :  { %v73_v20 = vadd.f32 %v72_v19, %v71_v18 }
  0xc1   :  { %v74_v21 = vrot.slane %v73_v20, 2 }
  0xc3   :  { %v75_v22 = vadd.f32 %v74_v21, %v73_v20 }
  0xc5   :  { %v76_v23 = vrot.slane %v75_v22, 1 }
  0xc6   :  { %v90_v24 = vpop.xlane.xlu0 %89 }
  0xc7   :  { %v91_v25 = vrot.slane %v90_v24, 4  ;;  %v77_v26 = vadd.f32 %v76_v23, %v75_v22 }
  0xc9   :  { %v92_v27 = vadd.f32 %v91_v25, %v90_v24  ;;  %131 = vpush %v77_v26 }
  0xcb   :  { %v93_v28 = vrot.slane %v92_v27, 2 }
  0xcd   :  { %v94_v29 = vadd.f32 %v93_v28, %v92_v27 }
  0xcf   :  { %v95_v30 = vrot.slane %v94_v29, 1 }
  0xd1   :  { %v96_v31 = vadd.f32 %v95_v30, %v94_v29 }
  0xd3   :  { %133 = vpush %v96_v31 }
  0xfa   :  { %s132_s1 = spop %131 }
  0xfb   :  { %100 = sst [smem:[#allocation9]] %s132_s1 }
  0xfc   :  { %196 = shalt.err (!%p193_p4)
}
  0xfd   :  { %s219_s27 = smov [#allocation9]   ;;  %s197_s10 = scalar_lea.hbm %s309_s4, 16 }
  0xfe   :  { %119 = dma.smem_to_hbm %s219_s27, 16, %s310_s5, [#allocation10]  }
  0xff   :  { %p198_p5 = scmp.ne.s32.totalorder %s309_s4, %s197_s10  ;;  %p201_p6 = scmp.lt.u32.totalorder %s197_s10, %s309_s4 }
 0x101   :  { %p203_p7 = pnand %p201_p6, %p198_p5 }
 0x104   :  { %s134_s30 = spop %133 }
 0x105   :  { %s98_s6 = smul.f32 -0.5, %s134_s30 }
 0x107   :  { %s101_s7 = sadd.f32 %s132_s1, %s98_s6 }
 0x109   :  { %103 = sst [smem:[#allocation8]] %s101_s7 }
 0x10a   :  { %206 = shalt.err (!%p203_p7)
}
 0x10b   :  { %s220_s15 = smov [#allocation8]  }
 0x10c   :  { %111 = dma.smem_to_hbm %s220_s15, 16, %s309_s4, [#allocation5]  }
 0x10d   :  { %211 = dma.done.wait [#allocation5], 16  }
 0x10e   :  { %212 = vsyncadd [#allocation5], 4294967280 }
 0x10f   :  { %213 = dma.done.wait [#allocation10], 16  }
 0x110   :  { %214 = vsyncadd [#allocation10], 4294967280 }
 0x111   :  { %126 = sfence }
 0x112   :  { %127 = vsyncpa [#allocation4], 1 }
 0x113   :  { %128 = vsyncpa [#allocation7], 1 }
 0x114   :  { %129 = vsyncpa [#allocation5], 1 }
 0x115   :  { %130 = vsyncpa [#allocation10], 1 }

</bundles_post_ra>
